<compile_context>
chip_gen: v6e
topology: v6e:2x2x1
jax: 0.10.0
libtpu: 0.0.40
codegen_flags: <defaults>
</compile_context>

<pallas_src>
import math

import jax
import jax.numpy as jnp
from jax.experimental import pallas as pl
from jax.experimental.pallas import tpu as pltpu

BN_EPS = 1e-5
SUBLANE = 8
LANE = 128


def _round_up(x, m):
    return -(-x // m) * m


def _vmem_capacity_bytes():
    try:
        return int(pltpu.get_tpu_info().vmem_capacity_bytes)
    except Exception:
        return 64 << 20  # conservative default (v7x per-TC VMEM)


# ---------------------------------------------------------------------------
# Fused kernel
# ---------------------------------------------------------------------------
def _make_fused_kernel(n_blocks):
    """Kernel signature: (x_ref, w0, b0, w1, b1, ..., fc_w, fc_b, o_ref)."""

    def kernel(x_ref, *refs):
        o_ref = refs[-1]
        prm = refs[:-1]
        # Cast f32 activations to bf16 on-chip (cheap VPU work, hidden under MXU).
        h = x_ref[...].astype(jnp.bfloat16)
        idx = 0
        for _ in range(n_blocks):
            w = prm[idx][...]                # bf16, BN pre-folded, lane-padded
            b = prm[idx + 1][...]            # f32,  BN pre-folded, lane-padded
            idx += 2
            y = jnp.dot(h, w, preferred_element_type=jnp.float32)
            h = jnp.maximum(y + b, 0.0).astype(jnp.bfloat16)   # f32 epilogue, bf16 feed
        fc_w = prm[idx][...]                 # bf16, rows/cols zero-padded to 128
        fc_b = prm[idx + 1][...]             # f32,  zero-padded to 128 lanes
        y = jnp.dot(h, fc_w, preferred_element_type=jnp.float32)
        o_ref[...] = (y + fc_b).astype(o_ref.dtype)

    return kernel


def fused_value_head_call(x2d, folded_blocks, fc_folded, *, tile_m, vmem_limit_bytes):
    """x2d: (B_pad, D0_pad) f32; folded_blocks: [(w bf16, b f32)]; fc_folded: (w, b)."""
    B_pad, D0 = x2d.shape
    dout_pad = fc_folded[0].shape[1]
    grid = (B_pad // tile_m,)
    kernel = _make_fused_kernel(len(folded_blocks))

    def build_and_run(single_buffer_weights):
        def weight_spec(shape):
            idx = lambda i: (0, 0)
            if single_buffer_weights:
                try:
                    # Grid-invariant operand: one VMEM buffer is enough.
                    return pl.BlockSpec(shape, idx, pipeline_mode=pl.Buffered(1))
                except TypeError:
                    return pl.BlockSpec(shape, idx)
            return pl.BlockSpec(shape, idx)

        inputs = [x2d]
        in_specs = [pl.BlockSpec((tile_m, D0), lambda i: (i, 0))]
        flops = 0
        bytes_accessed = x2d.size * x2d.dtype.itemsize
        for (w, b) in list(folded_blocks) + [fc_folded]:
            inputs += [w, b]
            in_specs += [weight_spec(w.shape), weight_spec(b.shape)]
            flops += 2 * B_pad * w.shape[0] * w.shape[1]
            bytes_accessed += w.size * w.dtype.itemsize + b.size * b.dtype.itemsize
        bytes_accessed += B_pad * dout_pad * 4  # f32 output

        return pl.pallas_call(
            kernel,
            out_shape=jax.ShapeDtypeStruct((B_pad, dout_pad), jnp.float32),
            grid=grid,
            in_specs=in_specs,
            out_specs=pl.BlockSpec((tile_m, dout_pad), lambda i: (i, 0)),
            compiler_params=pltpu.CompilerParams(
                dimension_semantics=("parallel",),
                vmem_limit_bytes=vmem_limit_bytes),
            cost_estimate=pl.CostEstimate(
                flops=flops, transcendentals=0, bytes_accessed=bytes_accessed),
        )(*inputs)

    try:
        return build_and_run(single_buffer_weights=True)
    except Exception:
        # Fallback (functionally identical): default double-buffered weight specs.
        return build_and_run(single_buffer_weights=False)


# ---------------------------------------------------------------------------
# Module: channel schedule + parameter construction + folding + forward
# ---------------------------------------------------------------------------
def value_head_dims(n_embd, n_blocks_valuehead):
    """Replicates ValueHead.__init__ channel-reduction schedule. Returns list of (in, out)."""
    dims = []
    inchannels = n_embd
    log_reduction = int(math.log2(n_embd))
    common_reduction = log_reduction // n_blocks_valuehead
    n_additional = log_reduction % n_blocks_valuehead
    for i in range(n_blocks_valuehead):
        reduction = (
            common_reduction
            if n_additional + i < n_blocks_valuehead
            else common_reduction + 1
        )
        outchannels = inchannels // 2 ** reduction
        dims.append((inchannels * 64, outchannels * 64))
        inchannels = outchannels
    return dims  # last out is 64


def init_params(key, n_embd, n_blocks_valuehead):
    """PyTorch-style raw parameters (weights stored pre-transposed as (in, out))."""
    dims = value_head_dims(n_embd, n_blocks_valuehead)
    params = {"blocks": []}
    for (din, dout) in dims:
        key, kw, kb, kg, kbe, km, kv = jax.random.split(key, 7)
        bound = 1.0 / math.sqrt(din)
        blk = {
            "w": jax.random.uniform(kw, (din, dout), jnp.float32, -bound, bound),
            "b": jax.random.uniform(kb, (1, dout), jnp.float32, -bound, bound),
            "gamma": jax.random.uniform(kg, (1, dout), jnp.float32, 0.5, 1.5),
            "beta": 0.1 * jax.random.normal(kbe, (1, dout), jnp.float32),
            "mu": 0.1 * jax.random.normal(km, (1, dout), jnp.float32),
            "var": jax.random.uniform(kv, (1, dout), jnp.float32, 0.5, 1.5),
        }
        params["blocks"].append(blk)
    key, kw, kb = jax.random.split(key, 3)
    bound = 1.0 / math.sqrt(64)
    params["fc_w"] = jax.random.uniform(kw, (64, 3), jnp.float32, -bound, bound)
    params["fc_b"] = jax.random.uniform(kb, (1, 3), jnp.float32, -bound, bound)
    return params


def prepare_params(raw):
    """Fold BN(eval)+bias into weights, zero-pad every dim to a 128-lane multiple,
    cast weights to bf16. Padding is exact: padded lanes stay 0 through ReLU and
    multiply only zero rows downstream."""
    folded_blocks = []
    for blk in raw["blocks"]:
        scale = blk["gamma"] * jax.lax.rsqrt(blk["var"] + BN_EPS)       # (1, Dout)
        w = blk["w"] * scale                                            # (Din, Dout)
        b = (blk["b"] - blk["mu"]) * scale + blk["beta"]                # (1, Dout)
        din, dout = w.shape
        din_p, dout_p = _round_up(din, LANE), _round_up(dout, LANE)
        w_p = jnp.zeros((din_p, dout_p), jnp.float32).at[:din, :dout].set(w)
        b_p = jnp.zeros((1, dout_p), jnp.float32).at[:, :dout].set(b)
        folded_blocks.append((w_p.astype(jnp.bfloat16), b_p.astype(jnp.float32)))

    fc_w, fc_b = raw["fc_w"], raw["fc_b"]
    din, dout = fc_w.shape
    din_p, dout_p = _round_up(din, LANE), _round_up(dout, LANE)
    fc_w_p = jnp.zeros((din_p, dout_p), jnp.float32).at[:din, :dout].set(fc_w)
    fc_b_p = jnp.zeros((1, dout_p), jnp.float32).at[:, :dout].set(fc_b)

    d_in = raw["blocks"][0]["w"].shape[0]
    return {
        "folded_blocks": folded_blocks,
        "fc_folded": (fc_w_p.astype(jnp.bfloat16), fc_b_p),
        "fc_out": dout,
        "in_dim": d_in,
        "in_dim_pad": _round_up(d_in, LANE),
    }


def _choose_tile_m(B, act_bytes_per_row):
    """Small B -> single tile, no batch pad. Large B -> tile from {512,256,128} that
    minimizes pad waste and fits a VMEM activation budget."""
    vmem_cap = _vmem_capacity_bytes()
    act_budget = vmem_cap // 4       # leave room for weights / output / double buffers
    max_rows = max(SUBLANE, min(512, act_budget // max(act_bytes_per_row, 1)))
    if B <= max_rows:
        return B, B                  # block == full dims -> no (8,128) pad needed
    best = None
    for t in (512, 256, 128):
        if t > max_rows:
            continue
        b_pad = _round_up(B, t)
        key = (b_pad, -t)            # minimize pad waste, prefer larger tiles on ties
        if best is None or key < best[0]:
            best = (key, t, b_pad)
    if best is None:
        t = _round_up(max_rows, SUBLANE)
        return t, _round_up(B, t)
    return best[1], best[2]


def value_head_forward(x, prepared):
    B, T, C = x.shape
    h = x.reshape(B, T * C)                        # matches torch x.view(B, -1); stays f32
    D0, D0_pad = prepared["in_dim"], prepared["in_dim_pad"]
    assert T * C == D0, (T * C, D0)
    if D0_pad != D0:
        h = jnp.pad(h, ((0, 0), (0, D0_pad - D0)))

    max_hidden = max(w.shape[1] for (w, _) in prepared["folded_blocks"])
    # per-row VMEM: f32 input (x2 buffers) + f32 intermediates (x2 slack) + f32 out (x2)
    act_bytes_per_row = (D0_pad * 2 + max_hidden * 2 + LANE * 2) * 4
    tile_m, B_pad = _choose_tile_m(B, act_bytes_per_row)
    if B_pad != B:
        h = jnp.pad(h, ((0, B_pad - B), (0, 0)))

    weight_bytes = sum(
        w.size * w.dtype.itemsize + b.size * b.dtype.itemsize
        for (w, b) in list(prepared["folded_blocks"]) + [prepared["fc_folded"]])
    est = weight_bytes + tile_m * act_bytes_per_row
    vmem_cap = _vmem_capacity_bytes()
    vmem_limit = max(int(1.5 * est) + (4 << 20), 32 << 20)
    vmem_limit = int(min(vmem_limit, int(0.9 * vmem_cap), 100 << 20))

    out = fused_value_head_call(
        h, prepared["folded_blocks"], prepared["fc_folded"],
        tile_m=tile_m, vmem_limit_bytes=vmem_limit)
    return out[:B, :prepared["fc_out"]]


# ---------------------------------------------------------------------------
# References (for verification)
# ---------------------------------------------------------------------------
def value_head_reference_folded(x, prepared):
    """Pure-jnp reference using the same folded/padded bf16 weights as the kernel."""
    B, T, C = x.shape
    D0_pad = prepared["in_dim_pad"]
    h = x.reshape(B, T * C)
    if D0_pad != T * C:
        h = jnp.pad(h, ((0, 0), (0, D0_pad - T * C)))
    h = h.astype(jnp.bfloat16)
    for (w, b) in prepared["folded_blocks"]:
        y = jnp.dot(h, w, preferred_element_type=jnp.float32) + b
        h = jnp.maximum(y, 0.0).astype(jnp.bfloat16)
    fc_w, fc_b = prepared["fc_folded"]
    y = jnp.dot(h, fc_w, preferred_element_type=jnp.float32) + fc_b
    return y[:, :prepared["fc_out"]]


def value_head_reference_f32(x, raw):
    """Full-precision reference of the original module: Linear -> BN(eval) -> ReLU, fc."""
    B, T, C = x.shape
    h = x.reshape(B, T * C)
    for blk in raw["blocks"]:
        y = jnp.dot(h, blk["w"]) + blk["b"]
        y = (y - blk["mu"]) * jax.lax.rsqrt(blk["var"] + BN_EPS) * blk["gamma"] + blk["beta"]
        h = jnp.maximum(y, 0.0)
    return jnp.dot(h, raw["fc_w"]) + raw["fc_b"]


# ---------------------------------------------------------------------------
# Main
# ---------------------------------------------------------------------------
if __name__ == "__main__":
    # Small, consistent config: n_embd=8, T=64 (board squares), 2 value-head blocks.
    n_embd = 8
    n_blocks_valuehead = 2
    B, T, C = 2, 64, n_embd  # features flatten to 64 * n_embd = 512

    key = jax.random.PRNGKey(0)
    key, kx = jax.random.split(key)
    x = jax.random.normal(kx, (B, T, C), jnp.float32)

    raw_params = init_params(key, n_embd, n_blocks_valuehead)
    prepared = prepare_params(raw_params)

    out = jax.block_until_ready(value_head_forward(x, prepared))

    assert out.shape == (B, 3), out.shape
    assert bool(jnp.all(jnp.isfinite(out)))

    ref_folded = value_head_reference_folded(x, prepared)
    assert jnp.allclose(out, ref_folded, atol=2e-2, rtol=2e-2), (out, ref_folded)

    ref_f32 = value_head_reference_f32(x, raw_params)
    assert jnp.allclose(out, ref_f32, atol=5e-2, rtol=5e-2), (out, ref_f32)

    print("KERNEL_OK")
</pallas_src>

<mosaic_0001>
module attributes {stable_mosaic.version = 11 : i64} {
  func.func @kernel(%arg0: i32, %arg1: memref<2x512xf32, #tpu.memory_space<vmem>>, %arg2: memref<512x256xbf16, #tpu.memory_space<vmem>>, %arg3: memref<1x256xf32, #tpu.memory_space<vmem>>, %arg4: memref<256x128xbf16, #tpu.memory_space<vmem>>, %arg5: memref<1x128xf32, #tpu.memory_space<vmem>>, %arg6: memref<128x128xbf16, #tpu.memory_space<vmem>>, %arg7: memref<1x128xf32, #tpu.memory_space<vmem>>, %arg8: memref<2x128xf32, #tpu.memory_space<vmem>>) attributes {dimension_semantics = [#tpu.dimension_semantics<parallel>], iteration_bounds = array<i64: 1>, scalar_prefetch = 0 : i64, scratch_operands = 0 : i64, tpu.core_type = #tpu.core_type<tc>, window_params = [{transform_indices = @transform_0, window_bounds = array<i64: 2, 512>}, {pipeline_mode = #tpu.pipeline_mode<synchronous>, transform_indices = @transform_1, window_bounds = array<i64: 512, 256>}, {pipeline_mode = #tpu.pipeline_mode<synchronous>, transform_indices = @transform_2, window_bounds = array<i64: 1, 256>}, {pipeline_mode = #tpu.pipeline_mode<synchronous>, transform_indices = @transform_3, window_bounds = array<i64: 256, 128>}, {pipeline_mode = #tpu.pipeline_mode<synchronous>, transform_indices = @transform_4, window_bounds = array<i64: 1, 128>}, {pipeline_mode = #tpu.pipeline_mode<synchronous>, transform_indices = @transform_5, window_bounds = array<i64: 128, 128>}, {pipeline_mode = #tpu.pipeline_mode<synchronous>, transform_indices = @transform_6, window_bounds = array<i64: 1, 128>}, {transform_indices = @transform_7, window_bounds = array<i64: 2, 128>}]} {
    %c0 = arith.constant 0 : index
    %c0_0 = arith.constant 0 : index
    %0 = vector.load %arg1[%c0, %c0_0] : memref<2x512xf32, #tpu.memory_space<vmem>>, vector<2x512xf32>
    %1 = arith.truncf %0 : vector<2x512xf32> to vector<2x512xbf16>
    %c0_1 = arith.constant 0 : index
    %c0_2 = arith.constant 0 : index
    %2 = vector.load %arg2[%c0_1, %c0_2] : memref<512x256xbf16, #tpu.memory_space<vmem>>, vector<512x256xbf16>
    %c0_3 = arith.constant 0 : index
    %c0_4 = arith.constant 0 : index
    %3 = vector.load %arg3[%c0_3, %c0_4] : memref<1x256xf32, #tpu.memory_space<vmem>>, vector<1x256xf32>
    %cst = arith.constant dense<0.000000e+00> : vector<2x256xf32>
    %4 = tpu.matmul %1, %2, %cst {dimension_numbers = #tpu.dot_dimension_numbers<[1], [0], [0], [1], [0, 0, 1, 1], [], []>} : vector<2x512xbf16>, vector<512x256xbf16>, vector<2x256xf32> -> vector<2x256xf32>
    %5 = vector.broadcast %3 : vector<1x256xf32> to vector<2x256xf32>
    %6 = arith.addf %4, %5 : vector<2x256xf32>
    %cst_5 = arith.constant 0.000000e+00 : f32
    %7 = vector.broadcast %cst_5 : f32 to vector<2x256xf32>
    %8 = arith.maximumf %6, %7 : vector<2x256xf32>
    %9 = arith.truncf %8 : vector<2x256xf32> to vector<2x256xbf16>
    %c0_6 = arith.constant 0 : index
    %c0_7 = arith.constant 0 : index
    %10 = vector.load %arg4[%c0_6, %c0_7] : memref<256x128xbf16, #tpu.memory_space<vmem>>, vector<256x128xbf16>
    %c0_8 = arith.constant 0 : index
    %c0_9 = arith.constant 0 : index
    %11 = vector.load %arg5[%c0_8, %c0_9] : memref<1x128xf32, #tpu.memory_space<vmem>>, vector<1x128xf32>
    %cst_10 = arith.constant dense<0.000000e+00> : vector<2x128xf32>
    %12 = tpu.matmul %9, %10, %cst_10 {dimension_numbers = #tpu.dot_dimension_numbers<[1], [0], [0], [1], [0, 0, 1, 1], [], []>} : vector<2x256xbf16>, vector<256x128xbf16>, vector<2x128xf32> -> vector<2x128xf32>
    %13 = vector.broadcast %11 : vector<1x128xf32> to vector<2x128xf32>
    %14 = arith.addf %12, %13 : vector<2x128xf32>
    %cst_11 = arith.constant 0.000000e+00 : f32
    %15 = vector.broadcast %cst_11 : f32 to vector<2x128xf32>
    %16 = arith.maximumf %14, %15 : vector<2x128xf32>
    %17 = arith.truncf %16 : vector<2x128xf32> to vector<2x128xbf16>
    %c0_12 = arith.constant 0 : index
    %c0_13 = arith.constant 0 : index
    %18 = vector.load %arg6[%c0_12, %c0_13] : memref<128x128xbf16, #tpu.memory_space<vmem>>, vector<128x128xbf16>
    %c0_14 = arith.constant 0 : index
    %c0_15 = arith.constant 0 : index
    %19 = vector.load %arg7[%c0_14, %c0_15] : memref<1x128xf32, #tpu.memory_space<vmem>>, vector<1x128xf32>
    %cst_16 = arith.constant dense<0.000000e+00> : vector<2x128xf32>
    %20 = tpu.matmul %17, %18, %cst_16 {dimension_numbers = #tpu.dot_dimension_numbers<[1], [0], [0], [1], [0, 0, 1, 1], [], []>} : vector<2x128xbf16>, vector<128x128xbf16>, vector<2x128xf32> -> vector<2x128xf32>
    %21 = vector.broadcast %19 : vector<1x128xf32> to vector<2x128xf32>
    %22 = arith.addf %20, %21 : vector<2x128xf32>
    %c0_17 = arith.constant 0 : index
    %c0_18 = arith.constant 0 : index
    %23 = vector.load %arg8[%c0_17, %c0_18] : memref<2x128xf32, #tpu.memory_space<vmem>>, vector<2x128xf32>
    tpu.vector_store %arg8[%c0_17, %c0_18], %22 {strides = array<i32>} : memref<2x128xf32, #tpu.memory_space<vmem>>, vector<2x128xf32>,
    return
  }
  func.func @transform_0(%arg0: i32) -> (i32, i32) {
    %c0_i32 = arith.constant 0 : i32
    %c0_i32_0 = arith.constant 0 : i32
    return %arg0, %c0_i32 : i32, i32
  }
  func.func @transform_1(%arg0: i32) -> (i32, i32) {
    %c0_i32 = arith.constant 0 : i32
    %c0_i32_0 = arith.constant 0 : i32
    %c0_i32_1 = arith.constant 0 : i32
    return %c0_i32, %c0_i32_0 : i32, i32
  }
  func.func @transform_2(%arg0: i32) -> (i32, i32) {
    %c0_i32 = arith.constant 0 : i32
    %c0_i32_0 = arith.constant 0 : i32
    %c0_i32_1 = arith.constant 0 : i32
    return %c0_i32, %c0_i32_0 : i32, i32
  }
  func.func @transform_3(%arg0: i32) -> (i32, i32) {
    %c0_i32 = arith.constant 0 : i32
    %c0_i32_0 = arith.constant 0 : i32
    %c0_i32_1 = arith.constant 0 : i32
    return %c0_i32, %c0_i32_0 : i32, i32
  }
  func.func @transform_4(%arg0: i32) -> (i32, i32) {
    %c0_i32 = arith.constant 0 : i32
    %c0_i32_0 = arith.constant 0 : i32
    %c0_i32_1 = arith.constant 0 : i32
    return %c0_i32, %c0_i32_0 : i32, i32
  }
  func.func @transform_5(%arg0: i32) -> (i32, i32) {
    %c0_i32 = arith.constant 0 : i32
    %c0_i32_0 = arith.constant 0 : i32
    %c0_i32_1 = arith.constant 0 : i32
    return %c0_i32, %c0_i32_0 : i32, i32
  }
  func.func @transform_6(%arg0: i32) -> (i32, i32) {
    %c0_i32 = arith.constant 0 : i32
    %c0_i32_0 = arith.constant 0 : i32
    %c0_i32_1 = arith.constant 0 : i32
    return %c0_i32, %c0_i32_0 : i32, i32
  }
  func.func @transform_7(%arg0: i32) -> (i32, i32) {
    %c0_i32 = arith.constant 0 : i32
    %c0_i32_0 = arith.constant 0 : i32
    return %arg0, %c0_i32 : i32, i32
  }
}

module attributes {stable_mosaic.version = 11 : i64} {
  func.func @kernel(%arg0: i32, %arg1: memref<2x512xf32, #tpu.memory_space<vmem>>, %arg2: memref<512x256xbf16, #tpu.memory_space<vmem>>, %arg3: memref<1x256xf32, #tpu.memory_space<vmem>>, %arg4: memref<256x128xbf16, #tpu.memory_space<vmem>>, %arg5: memref<1x128xf32, #tpu.memory_space<vmem>>, %arg6: memref<128x128xbf16, #tpu.memory_space<vmem>>, %arg7: memref<1x128xf32, #tpu.memory_space<vmem>>, %arg8: memref<2x128xf32, #tpu.memory_space<vmem>>) attributes {dimension_semantics = [#tpu.dimension_semantics<parallel>], iteration_bounds = array<i64: 1>, scalar_prefetch = 0 : i64, scratch_operands = 0 : i64, tpu.core_type = #tpu.core_type<tc>, window_params = [{transform_indices = @transform_0, window_bounds = array<i64: 2, 512>}, {pipeline_mode = #tpu.pipeline_mode<synchronous>, transform_indices = @transform_1, window_bounds = array<i64: 512, 256>}, {pipeline_mode = #tpu.pipeline_mode<synchronous>, transform_indices = @transform_2, window_bounds = array<i64: 1, 256>}, {pipeline_mode = #tpu.pipeline_mode<synchronous>, transform_indices = @transform_3, window_bounds = array<i64: 256, 128>}, {pipeline_mode = #tpu.pipeline_mode<synchronous>, transform_indices = @transform_4, window_bounds = array<i64: 1, 128>}, {pipeline_mode = #tpu.pipeline_mode<synchronous>, transform_indices = @transform_5, window_bounds = array<i64: 128, 128>}, {pipeline_mode = #tpu.pipeline_mode<synchronous>, transform_indices = @transform_6, window_bounds = array<i64: 1, 128>}, {transform_indices = @transform_7, window_bounds = array<i64: 2, 128>}]} {
    %c0 = arith.constant 0 : index
    %c0_0 = arith.constant 0 : index
    %0 = vector.load %arg1[%c0, %c0_0] : memref<2x512xf32, #tpu.memory_space<vmem>>, vector<2x512xf32>
    %1 = arith.truncf %0 : vector<2x512xf32> to vector<2x512xbf16>
    %c0_1 = arith.constant 0 : index
    %c0_2 = arith.constant 0 : index
    %2 = vector.load %arg2[%c0_1, %c0_2] : memref<512x256xbf16, #tpu.memory_space<vmem>>, vector<512x256xbf16>
    %c0_3 = arith.constant 0 : index
    %c0_4 = arith.constant 0 : index
    %3 = vector.load %arg3[%c0_3, %c0_4] : memref<1x256xf32, #tpu.memory_space<vmem>>, vector<1x256xf32>
    %cst = arith.constant dense<0.000000e+00> : vector<2x256xf32>
    %4 = tpu.matmul %1, %2, %cst {dimension_numbers = #tpu.dot_dimension_numbers<[1], [0], [0], [1], [0, 0, 1, 1], [], []>} : vector<2x512xbf16>, vector<512x256xbf16>, vector<2x256xf32> -> vector<2x256xf32>
    %5 = vector.broadcast %3 : vector<1x256xf32> to vector<2x256xf32>
    %6 = arith.addf %4, %5 : vector<2x256xf32>
    %cst_5 = arith.constant 0.000000e+00 : f32
    %7 = vector.broadcast %cst_5 : f32 to vector<2x256xf32>
    %8 = arith.maximumf %6, %7 : vector<2x256xf32>
    %9 = arith.truncf %8 : vector<2x256xf32> to vector<2x256xbf16>
    %c0_6 = arith.constant 0 : index
    %c0_7 = arith.constant 0 : index
    %10 = vector.load %arg4[%c0_6, %c0_7] : memref<256x128xbf16, #tpu.memory_space<vmem>>, vector<256x128xbf16>
    %c0_8 = arith.constant 0 : index
    %c0_9 = arith.constant 0 : index
    %11 = vector.load %arg5[%c0_8, %c0_9] : memref<1x128xf32, #tpu.memory_space<vmem>>, vector<1x128xf32>
    %cst_10 = arith.constant dense<0.000000e+00> : vector<2x128xf32>
    %12 = tpu.matmul %9, %10, %cst_10 {dimension_numbers = #tpu.dot_dimension_numbers<[1], [0], [0], [1], [0, 0, 1, 1], [], []>} : vector<2x256xbf16>, vector<256x128xbf16>, vector<2x128xf32> -> vector<2x128xf32>
    %13 = vector.broadcast %11 : vector<1x128xf32> to vector<2x128xf32>
    %14 = arith.addf %12, %13 : vector<2x128xf32>
    %cst_11 = arith.constant 0.000000e+00 : f32
    %15 = vector.broadcast %cst_11 : f32 to vector<2x128xf32>
    %16 = arith.maximumf %14, %15 : vector<2x128xf32>
    %17 = arith.truncf %16 : vector<2x128xf32> to vector<2x128xbf16>
    %c0_12 = arith.constant 0 : index
    %c0_13 = arith.constant 0 : index
    %18 = vector.load %arg6[%c0_12, %c0_13] : memref<128x128xbf16, #tpu.memory_space<vmem>>, vector<128x128xbf16>
    %c0_14 = arith.constant 0 : index
    %c0_15 = arith.constant 0 : index
    %19 = vector.load %arg7[%c0_14, %c0_15] : memref<1x128xf32, #tpu.memory_space<vmem>>, vector<1x128xf32>
    %cst_16 = arith.constant dense<0.000000e+00> : vector<2x128xf32>
    %20 = tpu.matmul %17, %18, %cst_16 {dimension_numbers = #tpu.dot_dimension_numbers<[1], [0], [0], [1], [0, 0, 1, 1], [], []>} : vector<2x128xbf16>, vector<128x128xbf16>, vector<2x128xf32> -> vector<2x128xf32>
    %21 = vector.broadcast %19 : vector<1x128xf32> to vector<2x128xf32>
    %22 = arith.addf %20, %21 : vector<2x128xf32>
    %c0_17 = arith.constant 0 : index
    %c0_18 = arith.constant 0 : index
    %23 = vector.load %arg8[%c0_17, %c0_18] : memref<2x128xf32, #tpu.memory_space<vmem>>, vector<2x128xf32>
    tpu.vector_store %arg8[%c0_17, %c0_18], %22 {strides = array<i32>} : memref<2x128xf32, #tpu.memory_space<vmem>>, vector<2x128xf32>,
    return
  }
  func.func @transform_0(%arg0: i32) -> (i32, i32) {
    %c0_i32 = arith.constant 0 : i32
    %c0_i32_0 = arith.constant 0 : i32
    return %arg0, %c0_i32 : i32, i32
  }
  func.func @transform_1(%arg0: i32) -> (i32, i32) {
    %c0_i32 = arith.constant 0 : i32
    %c0_i32_0 = arith.constant 0 : i32
    %c0_i32_1 = arith.constant 0 : i32
    return %c0_i32, %c0_i32_0 : i32, i32
  }
  func.func @transform_2(%arg0: i32) -> (i32, i32) {
    %c0_i32 = arith.constant 0 : i32
    %c0_i32_0 = arith.constant 0 : i32
    %c0_i32_1 = arith.constant 0 : i32
    return %c0_i32, %c0_i32_0 : i32, i32
  }
  func.func @transform_3(%arg0: i32) -> (i32, i32) {
    %c0_i32 = arith.constant 0 : i32
    %c0_i32_0 = arith.constant 0 : i32
    %c0_i32_1 = arith.constant 0 : i32
    return %c0_i32, %c0_i32_0 : i32, i32
  }
  func.func @transform_4(%arg0: i32) -> (i32, i32) {
    %c0_i32 = arith.constant 0 : i32
    %c0_i32_0 = arith.constant 0 : i32
    %c0_i32_1 = arith.constant 0 : i32
    return %c0_i32, %c0_i32_0 : i32, i32
  }
  func.func @transform_5(%arg0: i32) -> (i32, i32) {
    %c0_i32 = arith.constant 0 : i32
    %c0_i32_0 = arith.constant 0 : i32
    %c0_i32_1 = arith.constant 0 : i32
    return %c0_i32, %c0_i32_0 : i32, i32
  }
  func.func @transform_6(%arg0: i32) -> (i32, i32) {
    %c0_i32 = arith.constant 0 : i32
    %c0_i32_0 = arith.constant 0 : i32
    %c0_i32_1 = arith.constant 0 : i32
    return %c0_i32, %c0_i32_0 : i32, i32
  }
  func.func @transform_7(%arg0: i32) -> (i32, i32) {
    %c0_i32 = arith.constant 0 : i32
    %c0_i32_0 = arith.constant 0 : i32
    return %arg0, %c0_i32 : i32, i32
  }
}

</mosaic_0001>

<bundles_post_ra>
// kernel: tpu_custom_call.1
= control target key start
LH: loop header
LB: loop body
LE: loop exit
PB: predicated region body
PF: predicated region fallthrough
CT: control target
= control target key end

     0   :  { %12 = vsyncpa [#allocation3], 0  ;;  %s1359_s0 = inlined_call_operand.hbm [shape: f32[2,512], index: 0, kind: input, shape index: {}]   ;;  %s1360_s1 = inlined_call_operand.hbm [shape: bf16[512,256], index: 1, kind: input, shape index: {}]   ;;  %s1361_s2 = inlined_call_operand.vmem [shape: f32[1,256], index: 2, kind: input, shape index: {}]   ;;  %s1362_s3 = inlined_call_operand.hbm [shape: bf16[256,128], index: 3, kind: input, shape index: {}]   ;;  %s1363_s4 = inlined_call_operand.vmem [shape: f32[1,128], index: 4, kind: input, shape index: {}]   ;;  %s1364_s5 = inlined_call_operand.hbm [shape: bf16[128,128], index: 5, kind: input, shape index: {}]   ;;  %s1365_s6 = inlined_call_operand.vmem [shape: f32[1,128], index: 6, kind: input, shape index: {}]   ;;  %s1366_s7 = inlined_call_operand.hbm [shape: f32[2,128], index: 7, kind: output, shape index: {}]  }
   0x1   :  { %13 = vsyncpa [#allocation6], 0 }
   0x2   :  { %14 = vsyncpa [#allocation9], 0 }
   0x3   :  { %15 = vsyncpa [#allocation4], 0  ;;  %s1278_s24 = smov [#allocation5]  }
   0x4   :  { %s31_s25 = sshll.u32 %s1278_s24, 4  ;;  %s32_s25 = int_to_ptr.vmem [resolvable:$true] %s31_s25 }
   0x5   :  { %s1178_s26 = scalar_lea.vmem %s32_s25, 8192  ;;  %p1183_p1 = scmp.lt.s32.totalorder %s32_s25, %s32_s25 }
   0x6   :  { %p1179_p0 = scmp.ne.s32.totalorder %s32_s25, %s1178_s26  ;;  %p1184_p2 = scmp.lt.s32.totalorder %s1178_s26, %s1178_s26 }
   0x8   :  { %p1185_p3 = por %p1184_p2, %p1183_p1 }
   0xa   :  { %p1186_p4 = pnand %p1185_p3, %p1179_p0 }
   0xc   :  { %1189 = shalt.err (!%p1186_p4)
}
   0xd   :  { %s1279_s27 = smov 128   ;;  %s1280_s28 = smov 8  }
   0xe   :  { %37 = dma.hbm_to_vmem [thread:$0]  %s1360_s1, 8192, %s32_s25, [#allocation6], %s1279_s27, %s1279_s27, %s1280_s28  }
   0xf   :  { %s1281_s8 = smov [#allocation2]   ;;  %s1282_s10 = smov [#allocation7]  }
  0x10   :  { %s22_s9 = sshll.u32 %s1281_s8, 4  ;;  %s45_s11 = sshll.u32 %s1282_s10, 4  ;;  %s23_s9 = int_to_ptr.vmem [resolvable:$true] %s22_s9  ;;  %s46_s11 = int_to_ptr.vmem [resolvable:$true] %s45_s11 }
  0x11   :  { %s1198_s12 = scalar_lea.vmem %s23_s9, 128  ;;  %p1203_p6 = scmp.lt.s32.totalorder %s23_s9, %s23_s9 }
  0x12   :  { %p1199_p5 = scmp.ne.s32.totalorder %s23_s9, %s1198_s12  ;;  %p1204_p7 = scmp.lt.s32.totalorder %s1198_s12, %s1198_s12 }
  0x14   :  { %p1205_p8 = por %p1204_p7, %p1203_p6 }
  0x16   :  { %p1206_p9 = pnand %p1205_p8, %p1199_p5 }
  0x18   :  { %1209 = shalt.err (!%p1206_p9)
}
  0x19   :  { %25 = dma.hbm_to_vmem [thread:$0]  %s1359_s0, 128, %s23_s9, [#allocation3]  }
  0x1a   :  { %s1218_s15 = scalar_lea.vmem %s46_s11, 2048  ;;  %p1223_p11 = scmp.lt.s32.totalorder %s46_s11, %s46_s11 }
  0x1b   :  { %p1219_p10 = scmp.ne.s32.totalorder %s46_s11, %s1218_s15  ;;  %p1224_p12 = scmp.lt.s32.totalorder %s1218_s15, %s1218_s15 }
  0x1d   :  { %p1225_p13 = por %p1224_p12, %p1223_p11 }
  0x1f   :  { %p1226_p0 = pnand %p1225_p13, %p1219_p10 }
  0x21   :  { %1229 = shalt.err (!%p1226_p0)
}
  0x22   :  { %s1283_s1 = smov 64   ;;  %s1284_s16 = smov 4  }
  0x23   :  { %51 = dma.hbm_to_vmem [thread:$0]  %s1362_s3, 2048, %s46_s11, [#allocation6], %s1283_s1, %s1283_s1, %s1284_s16  }
  0x24   :  { %s1285_s19 = smov [#allocation8]  }
  0x25   :  { %s59_s20 = sshll.u32 %s1285_s19, 4  ;;  %s60_s20 = int_to_ptr.vmem [resolvable:$true] %s59_s20 }
  0x26   :  { %s1238_s21 = scalar_lea.vmem %s60_s20, 1024  ;;  %p1243_p2 = scmp.lt.s32.totalorder %s60_s20, %s60_s20 }
  0x27   :  { %p1239_p1 = scmp.ne.s32.totalorder %s60_s20, %s1238_s21  ;;  %p1244_p3 = scmp.lt.s32.totalorder %s1238_s21, %s1238_s21 }
  0x29   :  { %p1245_p4 = por %p1244_p3, %p1243_p2 }
  0x2b   :  { %p1246_p5 = pnand %p1245_p4, %p1239_p1 }
  0x2d   :  { %1249 = shalt.err (!%p1246_p5)
}
  0x2e   :  { %65 = dma.hbm_to_vmem [thread:$0]  %s1364_s5, 1024, %s60_s20, [#allocation9], %s1283_s1, %s1283_s1, %s1284_s16  }
  0x2f   :  { %1270 = dma.done.wait [#allocation3], 128  }
  0x30   :  { %1271 = vsyncadd [#allocation3], 4294967168 }
  0x31   :  { %1272 = dma.done.wait [#allocation6], 10240  }
  0x32   :  { %1273 = vsyncadd [#allocation6], 4294957056 }
  0x33   :  { %1274 = dma.done.wait [#allocation9], 1024  }
  0x34   :  { %1275 = vsyncadd [#allocation9], 4294966272  ;;  %v1049_v0 = vld [vmem:[#allocation5 + $0x74] ss:$8 sps:$4 sm:$0xff]   ;;  %v1053_v2 = vld [vmem:[#allocation5 + $0x70] ss:$8 sps:$4 sm:$0xff]   ;;  %v87_v38 = vlaneseq }
  0x35   :  { %v1051_v1 = vld [vmem:[#allocation5 + $0x174] ss:$8 sps:$4 sm:$0xff]   ;;  %504 = vmatprep.subr.bf16.mxu0 %v1049_v0  ;;  %v1054_v3 = vld [vmem:[#allocation5 + $0x170] ss:$8 sps:$4 sm:$0xff]   ;;  %v1055_v4 = vld [vmem:[#allocation5 + $0x64] ss:$8 sps:$4 sm:$0xff]  }
  0x36   :  { %545 = vmatprep.subr.bf16.mxu1 %v1051_v1  ;;  %505 = vmatpush1.bf16.msra.mxu0 %v1053_v2  ;;  %v1057_v5 = vld [vmem:[#allocation5 + $0x164] ss:$8 sps:$4 sm:$0xff]   ;;  %v1059_v6 = vld [vmem:[#allocation5 + $0x60] ss:$8 sps:$4 sm:$0xff]   ;;  %v1061_v8 = vld [vmem:[#allocation5 + $0x54] ss:$8 sps:$4 sm:$0xff]  }
  0x37   :  { %546 = vmatpush1.bf16.msra.mxu1 %v1054_v3  ;;  %506 = vmatprep.subr.bf16.mxu0 %v1055_v4  ;;  %v1060_v7 = vld [vmem:[#allocation5 + $0x160] ss:$8 sps:$4 sm:$0xff]   ;;  %v1063_v9 = vld [vmem:[#allocation5 + $0x154] ss:$8 sps:$4 sm:$0xff]   ;;  %v1065_v10 = vld [vmem:[#allocation5 + $0x50] ss:$8 sps:$4 sm:$0xff]  }
  0x38   :  { %547 = vmatprep.subr.bf16.mxu1 %v1057_v5  ;;  %v1066_v11 = vld [vmem:[#allocation5 + $0x150] ss:$8 sps:$4 sm:$0xff]   ;;  %v1067_v12 = vld [vmem:[#allocation5 + $0x44] ss:$8 sps:$4 sm:$0xff]   ;;  %v1071_v14 = vld [vmem:[#allocation5 + $0x40] ss:$8 sps:$4 sm:$0xff]  }
  0x39   :  { %v1069_v13 = vld [vmem:[#allocation5 + $0x144] ss:$8 sps:$4 sm:$0xff]   ;;  %v1072_v15 = vld [vmem:[#allocation5 + $0x140] ss:$8 sps:$4 sm:$0xff]   ;;  %v1073_v16 = vld [vmem:[#allocation5 + $0x34] ss:$8 sps:$4 sm:$0xff]  }
  0x3a   :  { %507 = vmatpush1.bf16.msra.mxu0 %v1059_v6  ;;  %v1075_v17 = vld [vmem:[#allocation5 + $0x134] ss:$8 sps:$4 sm:$0xff]   ;;  %v1077_v18 = vld [vmem:[#allocation5 + $0x30] ss:$8 sps:$4 sm:$0xff]   ;;  %v1079_v20 = vld [vmem:[#allocation5 + $0x24] ss:$8 sps:$4 sm:$0xff]  }
  0x3b   :  { %548 = vmatpush1.bf16.msra.mxu1 %v1060_v7  ;;  %508 = vmatprep.subr.bf16.mxu0 %v1061_v8  ;;  %v1078_v19 = vld [vmem:[#allocation5 + $0x130] ss:$8 sps:$4 sm:$0xff]   ;;  %v1081_v21 = vld [vmem:[#allocation5 + $0x124] ss:$8 sps:$4 sm:$0xff]   ;;  %v1083_v22 = vld [vmem:[#allocation5 + $0x20] ss:$8 sps:$4 sm:$0xff]  }
  0x3c   :  { %549 = vmatprep.subr.bf16.mxu1 %v1063_v9  ;;  %v1084_v23 = vld [vmem:[#allocation5 + $0x120] ss:$8 sps:$4 sm:$0xff]   ;;  %v1085_v24 = vld [vmem:[#allocation5 + $0x14] ss:$8 sps:$4 sm:$0xff]   ;;  %v1089_v26 = vld [vmem:[#allocation5 + $0x10] ss:$8 sps:$4 sm:$0xff]  }
  0x3d   :  { %v1087_v25 = vld [vmem:[#allocation5 + $0x114] ss:$8 sps:$4 sm:$0xff]   ;;  %v1090_v27 = vld [vmem:[#allocation5 + $0x110] ss:$8 sps:$4 sm:$0xff]   ;;  %v1091_v28 = vld [vmem:[#allocation5 + $0x4] ss:$8 sps:$4 sm:$0xff]  }
  0x3e   :  { %509 = vmatpush1.bf16.msra.mxu0 %v1065_v10  ;;  %v1093_v29 = vld [vmem:[#allocation5 + $0x104] ss:$8 sps:$4 sm:$0xff]   ;;  %v1095_v30 = vld [vmem:[#allocation5] ss:$8 sps:$4 sm:$0xff]   ;;  %v1097_v32 = vld [vmem:[#allocation5 + $0xf4] ss:$8 sps:$4 sm:$0xff]  }
  0x3f   :  { %550 = vmatpush1.bf16.msra.mxu1 %v1066_v11  ;;  %510 = vmatprep.subr.bf16.mxu0 %v1067_v12  ;;  %v1096_v31 = vld [vmem:[#allocation5 + $0x100] ss:$8 sps:$4 sm:$0xff]   ;;  %v1099_v33 = vld [vmem:[#allocation5 + $0x1f4] ss:$8 sps:$4 sm:$0xff]   ;;  %v1101_v34 = vld [vmem:[#allocation5 + $0xf0] ss:$8 sps:$4 sm:$0xff]  }
  0x40   :  { %551 = vmatprep.subr.bf16.mxu1 %v1069_v13  ;;  %v1102_v35 = vld [vmem:[#allocation5 + $0x1f0] ss:$8 sps:$4 sm:$0xff]   ;;  %v1286_v36 = vmov 1983009808   ;;  %v1103_v39 = vld [vmem:[#allocation5 + $0xe4] ss:$8 sps:$4 sm:$0xff]  }
  0x41   :  { %v85_v37 = vunpack.c.l.s4 %v1286_v36  ;;  %v1105_v40 = vld [vmem:[#allocation5 + $0x1e4] ss:$8 sps:$4 sm:$0xff]   ;;  %v1107_v41 = vld [vmem:[#allocation5 + $0xe0] ss:$8 sps:$4 sm:$0xff]   ;;  %v1342_v43 = vshrl.u32 %v87_v38, 7  ;;  %v81_v53 = vld [vmem:[#allocation2] sm:$0xff] }
  0x42   :  { %511 = vmatpush1.bf16.msra.mxu0 %v1071_v14  ;;  %v1108_v44 = vld [vmem:[#allocation5 + $0x1e0] ss:$8 sps:$4 sm:$0xff]   ;;  %v1109_v45 = vld [vmem:[#allocation5 + $0xd4] ss:$8 sps:$4 sm:$0xff]   ;;  %v1113_v47 = vld [vmem:[#allocation5 + $0xd0] ss:$8 sps:$4 sm:$0xff]   ;;  %v83_v56 = vcombine.high %v81_v53, %v81_v53 }
  0x43   :  { %552 = vmatpush1.bf16.msra.mxu1 %v1072_v15  ;;  %512 = vmatprep.subr.bf16.mxu0 %v1073_v16  ;;  %v86_v42 = vunpack.c.0.s8 %v85_v37  ;;  %v1111_v46 = vld [vmem:[#allocation5 + $0x1d4] ss:$8 sps:$4 sm:$0xff]   ;;  %v1114_v48 = vld [vmem:[#allocation5 + $0x1d0] ss:$8 sps:$4 sm:$0xff]   ;;  %v1115_v50 = vld [vmem:[#allocation5 + $0xc4] ss:$8 sps:$4 sm:$0xff]  }
  0x44   :  { %553 = vmatprep.subr.bf16.mxu1 %v1075_v17  ;;  %v1117_v51 = vld [vmem:[#allocation5 + $0x1c4] ss:$8 sps:$4 sm:$0xff]   ;;  %v1119_v52 = vld [vmem:[#allocation5 + $0xc0] ss:$8 sps:$4 sm:$0xff]   ;;  %v1121_v57 = vld [vmem:[#allocation5 + $0xb4] ss:$8 sps:$4 sm:$0xff]  }
  0x45   :  { %v89_v49 = vsub.s32 %v86_v42, %v1342_v43  ;;  %v1120_v54 = vld [vmem:[#allocation5 + $0x1c0] ss:$8 sps:$4 sm:$0xff]   ;;  %v1123_v58 = vld [vmem:[#allocation5 + $0x1b4] ss:$8 sps:$4 sm:$0xff]   ;;  %v1125_v61 = vld [vmem:[#allocation5 + $0xb0] ss:$8 sps:$4 sm:$0xff]  }
  0x46   :  { %513 = vmatpush1.bf16.msra.mxu0 %v1077_v18  ;;  %v1126_v62 = vld [vmem:[#allocation5 + $0x1b0] ss:$8 sps:$4 sm:$0xff]   ;;  %v1127_v1 = vld [vmem:[#allocation5 + $0xa4] ss:$8 sps:$4 sm:$0xff]   ;;  %v1131_v4 = vld [vmem:[#allocation5 + $0xa0] ss:$8 sps:$4 sm:$0xff]  }
  0x47   :  { %554 = vmatpush1.bf16.msra.mxu1 %v1078_v19  ;;  %514 = vmatprep.subr.bf16.mxu0 %v1079_v20  ;;  %v90_v55 = vrot.slane %v81_v53, %v89_v49  ;;  %v97_v60 = vrot.slane %v83_v56, %v89_v49  ;;  %v1129_v2 = vld [vmem:[#allocation5 + $0x1a4] ss:$8 sps:$4 sm:$0xff]   ;;  %v1132_v5 = vld [vmem:[#allocation5 + $0x1a0] ss:$8 sps:$4 sm:$0xff]   ;;  %v1133_v6 = vld [vmem:[#allocation5 + $0x94] ss:$8 sps:$4 sm:$0xff]  }
  0x48   :  { %555 = vmatprep.subr.bf16.mxu1 %v1081_v21  ;;  %v1135_v7 = vld [vmem:[#allocation5 + $0x194] ss:$8 sps:$4 sm:$0xff]   ;;  %v1137_v8 = vld [vmem:[#allocation5 + $0x90] ss:$8 sps:$4 sm:$0xff]   ;;  %v1139_v10 = vld [vmem:[#allocation5 + $0x84] ss:$8 sps:$4 sm:$0xff]  }
  0x49   :  { %v98_v59 = vcombine.high %v90_v55, %v90_v55  ;;  %v99_v0 = vcombine.high %v97_v60, %v97_v60  ;;  %v1138_v9 = vld [vmem:[#allocation5 + $0x190] ss:$8 sps:$4 sm:$0xff]   ;;  %v1141_v11 = vld [vmem:[#allocation5 + $0x184] ss:$8 sps:$4 sm:$0xff]   ;;  %v1143_v12 = vld [vmem:[#allocation5 + $0x80] ss:$8 sps:$4 sm:$0xff]   ;;  %v104_v15 = vpack.c.bf16 %v90_v55, %v90_v55  ;;  %v106_v16 = vpack.c.bf16 %v97_v60, %v97_v60 }
  0x4a   :  { %515 = vmatpush1.bf16.msra.mxu0 %v1083_v22  ;;  %v1144_v13 = vld [vmem:[#allocation5 + $0x180] ss:$8 sps:$4 sm:$0xff]   ;;  %v1146_v14 = vld [vmem:[#allocation7 + $0x78] sm:$0xff]   ;;  %v1148_v18 = vld [vmem:[#allocation7 + $0x70] sm:$0xff]   ;;  %v176_v38 = vsub.s32 0, %v1342_v43  ;;  %vm1288_vm0 = vmmov 0  }
  0x4b   :  { %556 = vmatpush1.bf16.msra.mxu1 %v1084_v23  ;;  %516 = vmatprep.subr.bf16.mxu0 %v1085_v24  ;;  %v105_v63 = vpack.c.bf16 %v98_v59, %v98_v59  ;;  %v107_v3 = vpack.c.bf16 %v99_v0, %v99_v0  ;;  %v1147_v17 = vld [vmem:[#allocation7 + $0x38] sm:$0xff]   ;;  %v1149_v19 = vld [vmem:[#allocation7 + $0x30] sm:$0xff]   ;;  %v1150_v20 = vld [vmem:[#allocation7 + $0x68] sm:$0xff]   ;;  %s1289_s26 = smov [#allocation10]  }
  0x4c   :  { %557 = vmatprep.subr.bf16.mxu1 %v1087_v25  ;;  %v1151_v21 = vld [vmem:[#allocation7 + $0x28] sm:$0xff]   ;;  %v1152_v22 = vld [vmem:[#allocation7 + $0x60] sm:$0xff]   ;;  %v1154_v24 = vld [vmem:[#allocation7 + $0x58] sm:$0xff]   ;;  %s885_s27 = sshll.u32 %s1289_s26, 4  ;;  %s886_s27 = int_to_ptr.vmem [resolvable:$true] %s885_s27 }
  0x4d   :  { %536 = vmatprep.mubr.bf16.mxu0 %v105_v63  ;;  %577 = vmatprep.mubr.bf16.mxu1 %v107_v3  ;;  %v1153_v23 = vld [vmem:[#allocation7 + $0x20] sm:$0xff]   ;;  %v1155_v25 = vld [vmem:[#allocation7 + $0x18] sm:$0xff]   ;;  %v1168_v60 = vld [vmem:[#allocation8 + $0x8] sm:$0xff]   ;;  %p1255_p7 = scmp.lt.s32.totalorder %s886_s27, %s886_s27 }
  0x4e   :  { %517 = vmatpush1.bf16.msra.mxu0 %v1089_v26  ;;  %v1156_v26 = vld [vmem:[#allocation7 + $0x50] sm:$0xff]   ;;  %v1165_v36 = vld [vmem:[#allocation8 + $0x20] sm:$0xff]   ;;  %v1166_v37 = vld [vmem:[#allocation8 + $0x18] sm:$0xff]  }
  0x4f   :  { %558 = vmatpush1.bf16.msra.mxu1 %v1090_v27  ;;  %518 = vmatprep.subr.bf16.mxu0 %v1091_v28  ;;  %v1157_v27 = vld [vmem:[#allocation7 + $0x10] sm:$0xff]   ;;  %v1158_v28 = vld [vmem:[#allocation7 + $0x48] sm:$0xff]   ;;  %v960_v63 = vld [vmem:[%s1363_s4] ss:$0 sm:$0xff]  ;;  %s1250_s4 = scalar_lea.vmem %s886_s27, 32 }
  0x50   :  { %559 = vmatprep.subr.bf16.mxu1 %v1093_v29  ;;  %v1159_v29 = vld [vmem:[#allocation7 + $0x8] sm:$0xff]   ;;  %p1251_p6 = scmp.ne.s32.totalorder %s886_s27, %s1250_s4  ;;  %p1256_p8 = scmp.lt.s32.totalorder %s1250_s4, %s1250_s4 }
  0x52   :  { %519 = vmatpush1.bf16.msra.mxu0 %v1095_v30  ;;  %v1160_v30 = vld [vmem:[#allocation7 + $0x40] sm:$0xff]   ;;  %p1257_p9 = por %p1256_p8, %p1255_p7 }
  0x53   :  { %560 = vmatpush1.bf16.msra.mxu1 %v1096_v31  ;;  %520 = vmatprep.subr.bf16.mxu0 %v1097_v32  ;;  %v1161_v31 = vld [vmem:[#allocation7] sm:$0xff]   ;;  %v1162_v32 = vld [vmem:[#allocation8 + $0x38] sm:$0xff]  }
  0x54   :  { %561 = vmatprep.subr.bf16.mxu1 %v1099_v33  ;;  %v1287_v33 = vmov 0.0   ;;  %p1258_p10 = pnand %p1257_p9, %p1251_p6 }
  0x56   :  { %521 = vmatpush2.bf16.msra.mxu0 %v1101_v34  ;;  %v1163_v34 = vld [vmem:[#allocation8 + $0x30] sm:$0xff]  }
  0x57   :  { %562 = vmatpush2.bf16.msra.mxu1 %v1102_v35  ;;  %522 = vmatprep.subr.bf16.mxu0 %v1103_v39  ;;  %v1164_v35 = vld [vmem:[#allocation8 + $0x28] sm:$0xff]   ;;  %v172_v39 = vld [vmem:[%s1361_s2] sm:$0x3] }
  0x58   :  { %563 = vmatprep.subr.bf16.mxu1 %v1105_v40  ;;  %v180_v40 = vsub.s32 1, %v1342_v43  ;;  %v1167_v43 = vld [vmem:[#allocation8 + $0x10] sm:$0xff]  }
  0x5a   :  { %523 = vmatpush2.bf16.msra.mxu0 %v1107_v41  ;;  %v177_v41 = vrot.slane %v172_v39, %v176_v38  ;;  %v181_v42 = vrot.slane %v172_v39, %v180_v40 }
  0x5b   :  { %564 = vmatpush2.bf16.msra.mxu1 %v1108_v44  ;;  %524 = vmatprep.subr.bf16.mxu0 %v1109_v45 }
  0x5c   :  { %565 = vmatprep.subr.bf16.mxu1 %v1111_v46 }
  0x5e   :  { %525 = vmatpush2.bf16.msra.mxu0 %v1113_v47 }
  0x5f   :  { %566 = vmatpush2.bf16.msra.mxu1 %v1114_v48  ;;  %526 = vmatprep.subr.bf16.mxu0 %v1115_v50 }
  0x60   :  { %567 = vmatprep.subr.bf16.mxu1 %v1117_v51 }
  0x62   :  { %527 = vmatpush2.bf16.msra.mxu0 %v1119_v52 }
  0x63   :  { %568 = vmatpush2.bf16.msra.mxu1 %v1120_v54  ;;  %528 = vmatprep.subr.bf16.mxu0 %v1121_v57 }
  0x64   :  { %569 = vmatprep.subr.bf16.mxu1 %v1123_v58 }
  0x66   :  { %529 = vmatpush2.bf16.msra.mxu0 %v1125_v61  ;;  %v1169_v61 = vld [vmem:[#allocation8] sm:$0xff]  }
  0x67   :  { %570 = vmatpush2.bf16.msra.mxu1 %v1126_v62  ;;  %530 = vmatprep.subr.bf16.mxu0 %v1127_v1 }
  0x68   :  { %571 = vmatprep.subr.bf16.mxu1 %v1129_v2 }
  0x6a   :  { %531 = vmatpush2.bf16.msra.mxu0 %v1131_v4 }
  0x6b   :  { %572 = vmatpush2.bf16.msra.mxu1 %v1132_v5  ;;  %532 = vmatprep.subr.bf16.mxu0 %v1133_v6 }
  0x6c   :  { %573 = vmatprep.subr.bf16.mxu1 %v1135_v7  ;;  %v977_v7 = vld [vmem:[%s1365_s6] ss:$0 sm:$0xff] }
  0x6e   :  { %533 = vmatpush2.bf16.msra.mxu0 %v1137_v8 }
  0x6f   :  { %574 = vmatpush2.bf16.msra.mxu1 %v1138_v9  ;;  %534 = vmatprep.subr.bf16.mxu0 %v1139_v10 }
  0x70   :  { %575 = vmatprep.subr.bf16.mxu1 %v1141_v11 }
  0x72   :  { %535 = vmatpush2.bf16.msra.mxu0 %v1143_v12 }
  0x73   :  { %576 = vmatpush2.bf16.msra.mxu1 %v1144_v13  ;;  %986 = vmatprep.subr.bf16.mxu0 %v1146_v14 }
  0x74   :  { %1017 = vmatprep.subr.bf16.mxu1 %v1287_v33 }
  0x75   :  { %537 = vmatmul.mubr.bf16.vlgmr.msra.gmra.mxu0 %v104_v15 }
  0x76   :  { %578 = vmatmul.mubr.bf16.vlgmr.msra.gmra.mxu1 %v106_v16  ;;  %987 = vmatpush3.bf16.msra.mxu0 %v1147_v17 }
  0x77   :  { %988 = vmatprep.subr.bf16.mxu0 %v1148_v18  ;;  %1018 = vmatpush3.bf16.msra.mxu1 %v1162_v32 }
  0x78   :  { %1019 = vmatprep.subr.bf16.mxu1 %v1287_v33  ;;  %1033 = vmatprep.mubr.msk.bf16.mxu1 %vm1288_vm0, %v1287_v33 }
  0x7a   :  { %989 = vmatpush3.bf16.msra.mxu0 %v1149_v19 }
  0x7b   :  { %990 = vmatprep.subr.bf16.mxu0 %v1150_v20  ;;  %1020 = vmatpush3.bf16.msra.mxu1 %v1163_v34 }
  0x7c   :  { %1021 = vmatprep.subr.bf16.mxu1 %v1287_v33 }
  0x7e   :  { %991 = vmatpush3.bf16.msra.mxu0 %v1151_v21 }
  0x7f   :  { %992 = vmatprep.subr.bf16.mxu0 %v1152_v22  ;;  %1022 = vmatpush3.bf16.msra.mxu1 %v1164_v35 }
  0x80   :  { %1023 = vmatprep.subr.bf16.mxu1 %v1287_v33 }
  0x82   :  { %993 = vmatpush3.bf16.msra.mxu0 %v1153_v23 }
  0x83   :  { %994 = vmatprep.subr.bf16.mxu0 %v1154_v24  ;;  %1024 = vmatpush3.bf16.msra.mxu1 %v1165_v36 }
  0x84   :  { %1025 = vmatprep.subr.bf16.mxu1 %v1287_v33 }
  0x86   :  { %995 = vmatpush3.bf16.msra.mxu0 %v1155_v25 }
  0x87   :  { %996 = vmatprep.subr.bf16.mxu0 %v1156_v26  ;;  %1026 = vmatpush3.bf16.msra.mxu1 %v1166_v37 }
  0x88   :  { %1027 = vmatprep.subr.bf16.mxu1 %v1287_v33 }
  0x8a   :  { %997 = vmatpush3.bf16.msra.mxu0 %v1157_v27 }
  0x8b   :  { %998 = vmatprep.subr.bf16.mxu0 %v1158_v28  ;;  %1028 = vmatpush3.bf16.msra.mxu1 %v1167_v43 }
  0x8c   :  { %1029 = vmatprep.subr.bf16.mxu1 %v1287_v33 }
  0x8e   :  { %999 = vmatpush3.bf16.msra.mxu0 %v1159_v29 }
  0x8f   :  { %1000 = vmatprep.subr.bf16.mxu0 %v1160_v30  ;;  %1030 = vmatpush3.bf16.msra.mxu1 %v1168_v60 }
  0x90   :  { %1031 = vmatprep.subr.bf16.mxu1 %v1287_v33 }
  0x92   :  { %1001 = vmatpush3.bf16.msra.mxu0 %v1161_v31 }
  0x93   :  { %1032 = vmatpush3.bf16.msra.mxu1 %v1169_v61 }
 0x135   :  { %v538_v44 = vpop.f32.mrf.mxu0 }
 0x136   :  { %v579_v45 = vpop.f32.mrf.mxu1  ;;  %v539_v46 = vadd.f32 %v538_v44, %v177_v41 }
 0x137   :  { %v540_v47 = vpop.f32.mrf.mxu0 }
 0x138   :  { %v581_v48 = vpop.f32.mrf.mxu1  ;;  %v580_v49 = vadd.f32 %v579_v45, %v539_v46  ;;  %v541_v50 = vadd.f32 %v540_v47, %v181_v42 }
 0x139   :  { %v542_v51 = vpop.f32.mrf.mxu0 }
 0x13a   :  { %v583_v52 = vpop.f32.mrf.mxu1  ;;  %v582_v53 = vadd.f32 %v581_v48, %v541_v50  ;;  %v586_v54 = vmax.f32 %v580_v49, 0.0 }
 0x13b   :  { %v543_v55 = vpop.f32.mrf.mxu0 }
 0x13c   :  { %v584_v56 = vpop.f32.mrf.mxu1  ;;  %v587_v57 = vmax.f32 %v582_v53, 0.0  ;;  %v588_v59 = vpack.c.bf16 %v586_v54, %v586_v54 }
 0x13e   :  { %v589_v58 = vpack.c.bf16 %v587_v57, %v587_v57 }
 0x140   :  { %757 = vmatprep.mubr.bf16.mxu0 %v589_v58 }
 0x141   :  { %758 = vmatmul.mubr.bf16.vlgmr.msra.gmra.mxu0 %v588_v59 }
 0x201   :  { %v1002_v62 = vpop.f32.mrf.mxu0 }
 0x203   :  { %v1003_v0 = vpop.f32.mrf.mxu0 }
 0x204   :  { %v1004_v1 = vadd.f32 %v1003_v0, %v1002_v62 }
 0x205   :  { %v1005_v2 = vpop.f32.mrf.mxu0 }
 0x206   :  { %v760_v3 = vadd.f32 %v1004_v1, %v960_v63 }
 0x207   :  { %v1006_v4 = vpop.f32.mrf.mxu0 }
 0x208   :  { %v765_v5 = vmax.f32 %v760_v3, 0.0 }
 0x20a   :  { %v766_v6 = vpack.c.bf16 %v765_v5, %v765_v5 }
 0x20c   :  { %1034 = vmatmul.mubr.bf16.vlgmr.msra.gmra.mxu1 %v766_v6 }
 0x2cc   :  { %v872_v8 = vpop.f32.mrf.mxu1 }
 0x2cd   :  { %v873_v9 = vadd.f32 %v977_v7, %v872_v8 }
 0x2ce   :  { %v1035_v10 = vpop.f32.mrf.mxu1 }
 0x2cf   :  { %878 = vst [vmem:[#allocation10] sm:$0x3] %v873_v9 }
 0x2d0   :  { %v875_v11 = vpop.f32.mrf.mxu1 }
 0x2d1   :  { %1261 = shalt.err (!%p1258_p10)
}
 0x2d2   :  { %888 = dma.vmem_to_hbm [thread:$0]  %s886_s27, 32, %s1366_s7, [#allocation4]   ;;  %v1036_v12 = vpop.f32.mrf.mxu1 }
 0x2d3   :  { %1276 = dma.done.wait [#allocation4], 32  }
 0x2d4   :  { %1277 = vsyncadd [#allocation4], 4294967264 }
 0x2d5   :  { %892 = vsyncpa [#allocation3], 1 }
 0x2d6   :  { %893 = vsyncpa [#allocation6], 1 }
 0x2d7   :  { %894 = vsyncpa [#allocation9], 1 }
 0x2d8   :  { %895 = vsyncpa [#allocation4], 1 }

// kernel: tpu_custom_call.1
= control target key start
LH: loop header
LB: loop body
LE: loop exit
PB: predicated region body
PF: predicated region fallthrough
CT: control target
= control target key end

     0   :  { %12 = vsyncpa [#allocation3], 0  ;;  %s1359_s0 = inlined_call_operand.hbm [shape: f32[2,512], index: 0, kind: input, shape index: {}]   ;;  %s1360_s1 = inlined_call_operand.hbm [shape: bf16[512,256], index: 1, kind: input, shape index: {}]   ;;  %s1361_s2 = inlined_call_operand.vmem [shape: f32[1,256], index: 2, kind: input, shape index: {}]   ;;  %s1362_s3 = inlined_call_operand.hbm [shape: bf16[256,128], index: 3, kind: input, shape index: {}]   ;;  %s1363_s4 = inlined_call_operand.vmem [shape: f32[1,128], index: 4, kind: input, shape index: {}]   ;;  %s1364_s5 = inlined_call_operand.hbm [shape: bf16[128,128], index: 5, kind: input, shape index: {}]   ;;  %s1365_s6 = inlined_call_operand.vmem [shape: f32[1,128], index: 6, kind: input, shape index: {}]   ;;  %s1366_s7 = inlined_call_operand.hbm [shape: f32[2,128], index: 7, kind: output, shape index: {}]  }
   0x1   :  { %13 = vsyncpa [#allocation6], 0 }
   0x2   :  { %14 = vsyncpa [#allocation9], 0 }
   0x3   :  { %15 = vsyncpa [#allocation4], 0  ;;  %s1278_s24 = smov [#allocation5]  }
   0x4   :  { %s31_s25 = sshll.u32 %s1278_s24, 4  ;;  %s32_s25 = int_to_ptr.vmem [resolvable:$true] %s31_s25 }
   0x5   :  { %s1178_s26 = scalar_lea.vmem %s32_s25, 8192  ;;  %p1183_p1 = scmp.lt.s32.totalorder %s32_s25, %s32_s25 }
   0x6   :  { %p1179_p0 = scmp.ne.s32.totalorder %s32_s25, %s1178_s26  ;;  %p1184_p2 = scmp.lt.s32.totalorder %s1178_s26, %s1178_s26 }
   0x8   :  { %p1185_p3 = por %p1184_p2, %p1183_p1 }
   0xa   :  { %p1186_p4 = pnand %p1185_p3, %p1179_p0 }
   0xc   :  { %1189 = shalt.err (!%p1186_p4)
}
   0xd   :  { %s1279_s27 = smov 128   ;;  %s1280_s28 = smov 8  }
   0xe   :  { %37 = dma.hbm_to_vmem [thread:$0]  %s1360_s1, 8192, %s32_s25, [#allocation6], %s1279_s27, %s1279_s27, %s1280_s28  }
   0xf   :  { %s1281_s8 = smov [#allocation2]   ;;  %s1282_s10 = smov [#allocation7]  }
  0x10   :  { %s22_s9 = sshll.u32 %s1281_s8, 4  ;;  %s45_s11 = sshll.u32 %s1282_s10, 4  ;;  %s23_s9 = int_to_ptr.vmem [resolvable:$true] %s22_s9  ;;  %s46_s11 = int_to_ptr.vmem [resolvable:$true] %s45_s11 }
  0x11   :  { %s1198_s12 = scalar_lea.vmem %s23_s9, 128  ;;  %p1203_p6 = scmp.lt.s32.totalorder %s23_s9, %s23_s9 }
  0x12   :  { %p1199_p5 = scmp.ne.s32.totalorder %s23_s9, %s1198_s12  ;;  %p1204_p7 = scmp.lt.s32.totalorder %s1198_s12, %s1198_s12 }
  0x14   :  { %p1205_p8 = por %p1204_p7, %p1203_p6 }
  0x16   :  { %p1206_p9 = pnand %p1205_p8, %p1199_p5 }
  0x18   :  { %1209 = shalt.err (!%p1206_p9)
}
  0x19   :  { %25 = dma.hbm_to_vmem [thread:$0]  %s1359_s0, 128, %s23_s9, [#allocation3]  }
  0x1a   :  { %s1218_s15 = scalar_lea.vmem %s46_s11, 2048  ;;  %p1223_p11 = scmp.lt.s32.totalorder %s46_s11, %s46_s11 }
  0x1b   :  { %p1219_p10 = scmp.ne.s32.totalorder %s46_s11, %s1218_s15  ;;  %p1224_p12 = scmp.lt.s32.totalorder %s1218_s15, %s1218_s15 }
  0x1d   :  { %p1225_p13 = por %p1224_p12, %p1223_p11 }
  0x1f   :  { %p1226_p0 = pnand %p1225_p13, %p1219_p10 }
  0x21   :  { %1229 = shalt.err (!%p1226_p0)
}
  0x22   :  { %s1283_s1 = smov 64   ;;  %s1284_s16 = smov 4  }
  0x23   :  { %51 = dma.hbm_to_vmem [thread:$0]  %s1362_s3, 2048, %s46_s11, [#allocation6], %s1283_s1, %s1283_s1, %s1284_s16  }
  0x24   :  { %s1285_s19 = smov [#allocation8]  }
  0x25   :  { %s59_s20 = sshll.u32 %s1285_s19, 4  ;;  %s60_s20 = int_to_ptr.vmem [resolvable:$true] %s59_s20 }
  0x26   :  { %s1238_s21 = scalar_lea.vmem %s60_s20, 1024  ;;  %p1243_p2 = scmp.lt.s32.totalorder %s60_s20, %s60_s20 }
  0x27   :  { %p1239_p1 = scmp.ne.s32.totalorder %s60_s20, %s1238_s21  ;;  %p1244_p3 = scmp.lt.s32.totalorder %s1238_s21, %s1238_s21 }
  0x29   :  { %p1245_p4 = por %p1244_p3, %p1243_p2 }
  0x2b   :  { %p1246_p5 = pnand %p1245_p4, %p1239_p1 }
  0x2d   :  { %1249 = shalt.err (!%p1246_p5)
}
  0x2e   :  { %65 = dma.hbm_to_vmem [thread:$0]  %s1364_s5, 1024, %s60_s20, [#allocation9], %s1283_s1, %s1283_s1, %s1284_s16  }
  0x2f   :  { %1270 = dma.done.wait [#allocation3], 128  }
  0x30   :  { %1271 = vsyncadd [#allocation3], 4294967168 }
  0x31   :  { %1272 = dma.done.wait [#allocation6], 10240  }
  0x32   :  { %1273 = vsyncadd [#allocation6], 4294957056 }
  0x33   :  { %1274 = dma.done.wait [#allocation9], 1024  }
  0x34   :  { %1275 = vsyncadd [#allocation9], 4294966272  ;;  %v1049_v0 = vld [vmem:[#allocation5 + $0x74] ss:$8 sps:$4 sm:$0xff]   ;;  %v1053_v2 = vld [vmem:[#allocation5 + $0x70] ss:$8 sps:$4 sm:$0xff]   ;;  %v87_v38 = vlaneseq }
  0x35   :  { %v1051_v1 = vld [vmem:[#allocation5 + $0x174] ss:$8 sps:$4 sm:$0xff]   ;;  %504 = vmatprep.subr.bf16.mxu0 %v1049_v0  ;;  %v1054_v3 = vld [vmem:[#allocation5 + $0x170] ss:$8 sps:$4 sm:$0xff]   ;;  %v1055_v4 = vld [vmem:[#allocation5 + $0x64] ss:$8 sps:$4 sm:$0xff]  }
  0x36   :  { %545 = vmatprep.subr.bf16.mxu1 %v1051_v1  ;;  %505 = vmatpush1.bf16.msra.mxu0 %v1053_v2  ;;  %v1057_v5 = vld [vmem:[#allocation5 + $0x164] ss:$8 sps:$4 sm:$0xff]   ;;  %v1059_v6 = vld [vmem:[#allocation5 + $0x60] ss:$8 sps:$4 sm:$0xff]   ;;  %v1061_v8 = vld [vmem:[#allocation5 + $0x54] ss:$8 sps:$4 sm:$0xff]  }
  0x37   :  { %546 = vmatpush1.bf16.msra.mxu1 %v1054_v3  ;;  %506 = vmatprep.subr.bf16.mxu0 %v1055_v4  ;;  %v1060_v7 = vld [vmem:[#allocation5 + $0x160] ss:$8 sps:$4 sm:$0xff]   ;;  %v1063_v9 = vld [vmem:[#allocation5 + $0x154] ss:$8 sps:$4 sm:$0xff]   ;;  %v1065_v10 = vld [vmem:[#allocation5 + $0x50] ss:$8 sps:$4 sm:$0xff]  }
  0x38   :  { %547 = vmatprep.subr.bf16.mxu1 %v1057_v5  ;;  %v1066_v11 = vld [vmem:[#allocation5 + $0x150] ss:$8 sps:$4 sm:$0xff]   ;;  %v1067_v12 = vld [vmem:[#allocation5 + $0x44] ss:$8 sps:$4 sm:$0xff]   ;;  %v1071_v14 = vld [vmem:[#allocation5 + $0x40] ss:$8 sps:$4 sm:$0xff]  }
  0x39   :  { %v1069_v13 = vld [vmem:[#allocation5 + $0x144] ss:$8 sps:$4 sm:$0xff]   ;;  %v1072_v15 = vld [vmem:[#allocation5 + $0x140] ss:$8 sps:$4 sm:$0xff]   ;;  %v1073_v16 = vld [vmem:[#allocation5 + $0x34] ss:$8 sps:$4 sm:$0xff]  }
  0x3a   :  { %507 = vmatpush1.bf16.msra.mxu0 %v1059_v6  ;;  %v1075_v17 = vld [vmem:[#allocation5 + $0x134] ss:$8 sps:$4 sm:$0xff]   ;;  %v1077_v18 = vld [vmem:[#allocation5 + $0x30] ss:$8 sps:$4 sm:$0xff]   ;;  %v1079_v20 = vld [vmem:[#allocation5 + $0x24] ss:$8 sps:$4 sm:$0xff]  }
  0x3b   :  { %548 = vmatpush1.bf16.msra.mxu1 %v1060_v7  ;;  %508 = vmatprep.subr.bf16.mxu0 %v1061_v8  ;;  %v1078_v19 = vld [vmem:[#allocation5 + $0x130] ss:$8 sps:$4 sm:$0xff]   ;;  %v1081_v21 = vld [vmem:[#allocation5 + $0x124] ss:$8 sps:$4 sm:$0xff]   ;;  %v1083_v22 = vld [vmem:[#allocation5 + $0x20] ss:$8 sps:$4 sm:$0xff]  }
  0x3c   :  { %549 = vmatprep.subr.bf16.mxu1 %v1063_v9  ;;  %v1084_v23 = vld [vmem:[#allocation5 + $0x120] ss:$8 sps:$4 sm:$0xff]   ;;  %v1085_v24 = vld [vmem:[#allocation5 + $0x14] ss:$8 sps:$4 sm:$0xff]   ;;  %v1089_v26 = vld [vmem:[#allocation5 + $0x10] ss:$8 sps:$4 sm:$0xff]  }
  0x3d   :  { %v1087_v25 = vld [vmem:[#allocation5 + $0x114] ss:$8 sps:$4 sm:$0xff]   ;;  %v1090_v27 = vld [vmem:[#allocation5 + $0x110] ss:$8 sps:$4 sm:$0xff]   ;;  %v1091_v28 = vld [vmem:[#allocation5 + $0x4] ss:$8 sps:$4 sm:$0xff]  }
  0x3e   :  { %509 = vmatpush1.bf16.msra.mxu0 %v1065_v10  ;;  %v1093_v29 = vld [vmem:[#allocation5 + $0x104] ss:$8 sps:$4 sm:$0xff]   ;;  %v1095_v30 = vld [vmem:[#allocation5] ss:$8 sps:$4 sm:$0xff]   ;;  %v1097_v32 = vld [vmem:[#allocation5 + $0xf4] ss:$8 sps:$4 sm:$0xff]  }
  0x3f   :  { %550 = vmatpush1.bf16.msra.mxu1 %v1066_v11  ;;  %510 = vmatprep.subr.bf16.mxu0 %v1067_v12  ;;  %v1096_v31 = vld [vmem:[#allocation5 + $0x100] ss:$8 sps:$4 sm:$0xff]   ;;  %v1099_v33 = vld [vmem:[#allocation5 + $0x1f4] ss:$8 sps:$4 sm:$0xff]   ;;  %v1101_v34 = vld [vmem:[#allocation5 + $0xf0] ss:$8 sps:$4 sm:$0xff]  }
  0x40   :  { %551 = vmatprep.subr.bf16.mxu1 %v1069_v13  ;;  %v1102_v35 = vld [vmem:[#allocation5 + $0x1f0] ss:$8 sps:$4 sm:$0xff]   ;;  %v1286_v36 = vmov 1983009808   ;;  %v1103_v39 = vld [vmem:[#allocation5 + $0xe4] ss:$8 sps:$4 sm:$0xff]  }
  0x41   :  { %v85_v37 = vunpack.c.l.s4 %v1286_v36  ;;  %v1105_v40 = vld [vmem:[#allocation5 + $0x1e4] ss:$8 sps:$4 sm:$0xff]   ;;  %v1107_v41 = vld [vmem:[#allocation5 + $0xe0] ss:$8 sps:$4 sm:$0xff]   ;;  %v1342_v43 = vshrl.u32 %v87_v38, 7  ;;  %v81_v53 = vld [vmem:[#allocation2] sm:$0xff] }
  0x42   :  { %511 = vmatpush1.bf16.msra.mxu0 %v1071_v14  ;;  %v1108_v44 = vld [vmem:[#allocation5 + $0x1e0] ss:$8 sps:$4 sm:$0xff]   ;;  %v1109_v45 = vld [vmem:[#allocation5 + $0xd4] ss:$8 sps:$4 sm:$0xff]   ;;  %v1113_v47 = vld [vmem:[#allocation5 + $0xd0] ss:$8 sps:$4 sm:$0xff]   ;;  %v83_v56 = vcombine.high %v81_v53, %v81_v53 }
  0x43   :  { %552 = vmatpush1.bf16.msra.mxu1 %v1072_v15  ;;  %512 = vmatprep.subr.bf16.mxu0 %v1073_v16  ;;  %v86_v42 = vunpack.c.0.s8 %v85_v37  ;;  %v1111_v46 = vld [vmem:[#allocation5 + $0x1d4] ss:$8 sps:$4 sm:$0xff]   ;;  %v1114_v48 = vld [vmem:[#allocation5 + $0x1d0] ss:$8 sps:$4 sm:$0xff]   ;;  %v1115_v50 = vld [vmem:[#allocation5 + $0xc4] ss:$8 sps:$4 sm:$0xff]  }
  0x44   :  { %553 = vmatprep.subr.bf16.mxu1 %v1075_v17  ;;  %v1117_v51 = vld [vmem:[#allocation5 + $0x1c4] ss:$8 sps:$4 sm:$0xff]   ;;  %v1119_v52 = vld [vmem:[#allocation5 + $0xc0] ss:$8 sps:$4 sm:$0xff]   ;;  %v1121_v57 = vld [vmem:[#allocation5 + $0xb4] ss:$8 sps:$4 sm:$0xff]  }
  0x45   :  { %v89_v49 = vsub.s32 %v86_v42, %v1342_v43  ;;  %v1120_v54 = vld [vmem:[#allocation5 + $0x1c0] ss:$8 sps:$4 sm:$0xff]   ;;  %v1123_v58 = vld [vmem:[#allocation5 + $0x1b4] ss:$8 sps:$4 sm:$0xff]   ;;  %v1125_v61 = vld [vmem:[#allocation5 + $0xb0] ss:$8 sps:$4 sm:$0xff]  }
  0x46   :  { %513 = vmatpush1.bf16.msra.mxu0 %v1077_v18  ;;  %v1126_v62 = vld [vmem:[#allocation5 + $0x1b0] ss:$8 sps:$4 sm:$0xff]   ;;  %v1127_v1 = vld [vmem:[#allocation5 + $0xa4] ss:$8 sps:$4 sm:$0xff]   ;;  %v1131_v4 = vld [vmem:[#allocation5 + $0xa0] ss:$8 sps:$4 sm:$0xff]  }
  0x47   :  { %554 = vmatpush1.bf16.msra.mxu1 %v1078_v19  ;;  %514 = vmatprep.subr.bf16.mxu0 %v1079_v20  ;;  %v90_v55 = vrot.slane %v81_v53, %v89_v49  ;;  %v97_v60 = vrot.slane %v83_v56, %v89_v49  ;;  %v1129_v2 = vld [vmem:[#allocation5 + $0x1a4] ss:$8 sps:$4 sm:$0xff]   ;;  %v1132_v5 = vld [vmem:[#allocation5 + $0x1a0] ss:$8 sps:$4 sm:$0xff]   ;;  %v1133_v6 = vld [vmem:[#allocation5 + $0x94] ss:$8 sps:$4 sm:$0xff]  }
  0x48   :  { %555 = vmatprep.subr.bf16.mxu1 %v1081_v21  ;;  %v1135_v7 = vld [vmem:[#allocation5 + $0x194] ss:$8 sps:$4 sm:$0xff]   ;;  %v1137_v8 = vld [vmem:[#allocation5 + $0x90] ss:$8 sps:$4 sm:$0xff]   ;;  %v1139_v10 = vld [vmem:[#allocation5 + $0x84] ss:$8 sps:$4 sm:$0xff]  }
  0x49   :  { %v98_v59 = vcombine.high %v90_v55, %v90_v55  ;;  %v99_v0 = vcombine.high %v97_v60, %v97_v60  ;;  %v1138_v9 = vld [vmem:[#allocation5 + $0x190] ss:$8 sps:$4 sm:$0xff]   ;;  %v1141_v11 = vld [vmem:[#allocation5 + $0x184] ss:$8 sps:$4 sm:$0xff]   ;;  %v1143_v12 = vld [vmem:[#allocation5 + $0x80] ss:$8 sps:$4 sm:$0xff]   ;;  %v104_v15 = vpack.c.bf16 %v90_v55, %v90_v55  ;;  %v106_v16 = vpack.c.bf16 %v97_v60, %v97_v60 }
  0x4a   :  { %515 = vmatpush1.bf16.msra.mxu0 %v1083_v22  ;;  %v1144_v13 = vld [vmem:[#allocation5 + $0x180] ss:$8 sps:$4 sm:$0xff]   ;;  %v1146_v14 = vld [vmem:[#allocation7 + $0x78] sm:$0xff]   ;;  %v1148_v18 = vld [vmem:[#allocation7 + $0x70] sm:$0xff]   ;;  %v176_v38 = vsub.s32 0, %v1342_v43  ;;  %vm1288_vm0 = vmmov 0  }
  0x4b   :  { %556 = vmatpush1.bf16.msra.mxu1 %v1084_v23  ;;  %516 = vmatprep.subr.bf16.mxu0 %v1085_v24  ;;  %v105_v63 = vpack.c.bf16 %v98_v59, %v98_v59  ;;  %v107_v3 = vpack.c.bf16 %v99_v0, %v99_v0  ;;  %v1147_v17 = vld [vmem:[#allocation7 + $0x38] sm:$0xff]   ;;  %v1149_v19 = vld [vmem:[#allocation7 + $0x30] sm:$0xff]   ;;  %v1150_v20 = vld [vmem:[#allocation7 + $0x68] sm:$0xff]   ;;  %s1289_s26 = smov [#allocation10]  }
  0x4c   :  { %557 = vmatprep.subr.bf16.mxu1 %v1087_v25  ;;  %v1151_v21 = vld [vmem:[#allocation7 + $0x28] sm:$0xff]   ;;  %v1152_v22 = vld [vmem:[#allocation7 + $0x60] sm:$0xff]   ;;  %v1154_v24 = vld [vmem:[#allocation7 + $0x58] sm:$0xff]   ;;  %s885_s27 = sshll.u32 %s1289_s26, 4  ;;  %s886_s27 = int_to_ptr.vmem [resolvable:$true] %s885_s27 }
  0x4d   :  { %536 = vmatprep.mubr.bf16.mxu0 %v105_v63  ;;  %577 = vmatprep.mubr.bf16.mxu1 %v107_v3  ;;  %v1153_v23 = vld [vmem:[#allocation7 + $0x20] sm:$0xff]   ;;  %v1155_v25 = vld [vmem:[#allocation7 + $0x18] sm:$0xff]   ;;  %v1168_v60 = vld [vmem:[#allocation8 + $0x8] sm:$0xff]   ;;  %p1255_p7 = scmp.lt.s32.totalorder %s886_s27, %s886_s27 }
  0x4e   :  { %517 = vmatpush1.bf16.msra.mxu0 %v1089_v26  ;;  %v1156_v26 = vld [vmem:[#allocation7 + $0x50] sm:$0xff]   ;;  %v1165_v36 = vld [vmem:[#allocation8 + $0x20] sm:$0xff]   ;;  %v1166_v37 = vld [vmem:[#allocation8 + $0x18] sm:$0xff]  }
  0x4f   :  { %558 = vmatpush1.bf16.msra.mxu1 %v1090_v27  ;;  %518 = vmatprep.subr.bf16.mxu0 %v1091_v28  ;;  %v1157_v27 = vld [vmem:[#allocation7 + $0x10] sm:$0xff]   ;;  %v1158_v28 = vld [vmem:[#allocation7 + $0x48] sm:$0xff]   ;;  %v960_v63 = vld [vmem:[%s1363_s4] ss:$0 sm:$0xff]  ;;  %s1250_s4 = scalar_lea.vmem %s886_s27, 32 }
  0x50   :  { %559 = vmatprep.subr.bf16.mxu1 %v1093_v29  ;;  %v1159_v29 = vld [vmem:[#allocation7 + $0x8] sm:$0xff]   ;;  %p1251_p6 = scmp.ne.s32.totalorder %s886_s27, %s1250_s4  ;;  %p1256_p8 = scmp.lt.s32.totalorder %s1250_s4, %s1250_s4 }
  0x52   :  { %519 = vmatpush1.bf16.msra.mxu0 %v1095_v30  ;;  %v1160_v30 = vld [vmem:[#allocation7 + $0x40] sm:$0xff]   ;;  %p1257_p9 = por %p1256_p8, %p1255_p7 }
  0x53   :  { %560 = vmatpush1.bf16.msra.mxu1 %v1096_v31  ;;  %520 = vmatprep.subr.bf16.mxu0 %v1097_v32  ;;  %v1161_v31 = vld [vmem:[#allocation7] sm:$0xff]   ;;  %v1162_v32 = vld [vmem:[#allocation8 + $0x38] sm:$0xff]  }
  0x54   :  { %561 = vmatprep.subr.bf16.mxu1 %v1099_v33  ;;  %v1287_v33 = vmov 0.0   ;;  %p1258_p10 = pnand %p1257_p9, %p1251_p6 }
  0x56   :  { %521 = vmatpush2.bf16.msra.mxu0 %v1101_v34  ;;  %v1163_v34 = vld [vmem:[#allocation8 + $0x30] sm:$0xff]  }
  0x57   :  { %562 = vmatpush2.bf16.msra.mxu1 %v1102_v35  ;;  %522 = vmatprep.subr.bf16.mxu0 %v1103_v39  ;;  %v1164_v35 = vld [vmem:[#allocation8 + $0x28] sm:$0xff]   ;;  %v172_v39 = vld [vmem:[%s1361_s2] sm:$0x3] }
  0x58   :  { %563 = vmatprep.subr.bf16.mxu1 %v1105_v40  ;;  %v180_v40 = vsub.s32 1, %v1342_v43  ;;  %v1167_v43 = vld [vmem:[#allocation8 + $0x10] sm:$0xff]  }
  0x5a   :  { %523 = vmatpush2.bf16.msra.mxu0 %v1107_v41  ;;  %v177_v41 = vrot.slane %v172_v39, %v176_v38  ;;  %v181_v42 = vrot.slane %v172_v39, %v180_v40 }
  0x5b   :  { %564 = vmatpush2.bf16.msra.mxu1 %v1108_v44  ;;  %524 = vmatprep.subr.bf16.mxu0 %v1109_v45 }
  0x5c   :  { %565 = vmatprep.subr.bf16.mxu1 %v1111_v46 }
  0x5e   :  { %525 = vmatpush2.bf16.msra.mxu0 %v1113_v47 }
  0x5f   :  { %566 = vmatpush2.bf16.msra.mxu1 %v1114_v48  ;;  %526 = vmatprep.subr.bf16.mxu0 %v1115_v50 }
  0x60   :  { %567 = vmatprep.subr.bf16.mxu1 %v1117_v51 }
  0x62   :  { %527 = vmatpush2.bf16.msra.mxu0 %v1119_v52 }
  0x63   :  { %568 = vmatpush2.bf16.msra.mxu1 %v1120_v54  ;;  %528 = vmatprep.subr.bf16.mxu0 %v1121_v57 }
  0x64   :  { %569 = vmatprep.subr.bf16.mxu1 %v1123_v58 }
  0x66   :  { %529 = vmatpush2.bf16.msra.mxu0 %v1125_v61  ;;  %v1169_v61 = vld [vmem:[#allocation8] sm:$0xff]  }
  0x67   :  { %570 = vmatpush2.bf16.msra.mxu1 %v1126_v62  ;;  %530 = vmatprep.subr.bf16.mxu0 %v1127_v1 }
  0x68   :  { %571 = vmatprep.subr.bf16.mxu1 %v1129_v2 }
  0x6a   :  { %531 = vmatpush2.bf16.msra.mxu0 %v1131_v4 }
  0x6b   :  { %572 = vmatpush2.bf16.msra.mxu1 %v1132_v5  ;;  %532 = vmatprep.subr.bf16.mxu0 %v1133_v6 }
  0x6c   :  { %573 = vmatprep.subr.bf16.mxu1 %v1135_v7  ;;  %v977_v7 = vld [vmem:[%s1365_s6] ss:$0 sm:$0xff] }
  0x6e   :  { %533 = vmatpush2.bf16.msra.mxu0 %v1137_v8 }
  0x6f   :  { %574 = vmatpush2.bf16.msra.mxu1 %v1138_v9  ;;  %534 = vmatprep.subr.bf16.mxu0 %v1139_v10 }
  0x70   :  { %575 = vmatprep.subr.bf16.mxu1 %v1141_v11 }
  0x72   :  { %535 = vmatpush2.bf16.msra.mxu0 %v1143_v12 }
  0x73   :  { %576 = vmatpush2.bf16.msra.mxu1 %v1144_v13  ;;  %986 = vmatprep.subr.bf16.mxu0 %v1146_v14 }
  0x74   :  { %1017 = vmatprep.subr.bf16.mxu1 %v1287_v33 }
  0x75   :  { %537 = vmatmul.mubr.bf16.vlgmr.msra.gmra.mxu0 %v104_v15 }
  0x76   :  { %578 = vmatmul.mubr.bf16.vlgmr.msra.gmra.mxu1 %v106_v16  ;;  %987 = vmatpush3.bf16.msra.mxu0 %v1147_v17 }
  0x77   :  { %988 = vmatprep.subr.bf16.mxu0 %v1148_v18  ;;  %1018 = vmatpush3.bf16.msra.mxu1 %v1162_v32 }
  0x78   :  { %1019 = vmatprep.subr.bf16.mxu1 %v1287_v33  ;;  %1033 = vmatprep.mubr.msk.bf16.mxu1 %vm1288_vm0, %v1287_v33 }
  0x7a   :  { %989 = vmatpush3.bf16.msra.mxu0 %v1149_v19 }
  0x7b   :  { %990 = vmatprep.subr.bf16.mxu0 %v1150_v20  ;;  %1020 = vmatpush3.bf16.msra.mxu1 %v1163_v34 }
  0x7c   :  { %1021 = vmatprep.subr.bf16.mxu1 %v1287_v33 }
  0x7e   :  { %991 = vmatpush3.bf16.msra.mxu0 %v1151_v21 }
  0x7f   :  { %992 = vmatprep.subr.bf16.mxu0 %v1152_v22  ;;  %1022 = vmatpush3.bf16.msra.mxu1 %v1164_v35 }
  0x80   :  { %1023 = vmatprep.subr.bf16.mxu1 %v1287_v33 }
  0x82   :  { %993 = vmatpush3.bf16.msra.mxu0 %v1153_v23 }
  0x83   :  { %994 = vmatprep.subr.bf16.mxu0 %v1154_v24  ;;  %1024 = vmatpush3.bf16.msra.mxu1 %v1165_v36 }
  0x84   :  { %1025 = vmatprep.subr.bf16.mxu1 %v1287_v33 }
  0x86   :  { %995 = vmatpush3.bf16.msra.mxu0 %v1155_v25 }
  0x87   :  { %996 = vmatprep.subr.bf16.mxu0 %v1156_v26  ;;  %1026 = vmatpush3.bf16.msra.mxu1 %v1166_v37 }
  0x88   :  { %1027 = vmatprep.subr.bf16.mxu1 %v1287_v33 }
  0x8a   :  { %997 = vmatpush3.bf16.msra.mxu0 %v1157_v27 }
  0x8b   :  { %998 = vmatprep.subr.bf16.mxu0 %v1158_v28  ;;  %1028 = vmatpush3.bf16.msra.mxu1 %v1167_v43 }
  0x8c   :  { %1029 = vmatprep.subr.bf16.mxu1 %v1287_v33 }
  0x8e   :  { %999 = vmatpush3.bf16.msra.mxu0 %v1159_v29 }
  0x8f   :  { %1000 = vmatprep.subr.bf16.mxu0 %v1160_v30  ;;  %1030 = vmatpush3.bf16.msra.mxu1 %v1168_v60 }
  0x90   :  { %1031 = vmatprep.subr.bf16.mxu1 %v1287_v33 }
  0x92   :  { %1001 = vmatpush3.bf16.msra.mxu0 %v1161_v31 }
  0x93   :  { %1032 = vmatpush3.bf16.msra.mxu1 %v1169_v61 }
 0x135   :  { %v538_v44 = vpop.f32.mrf.mxu0 }
 0x136   :  { %v579_v45 = vpop.f32.mrf.mxu1  ;;  %v539_v46 = vadd.f32 %v538_v44, %v177_v41 }
 0x137   :  { %v540_v47 = vpop.f32.mrf.mxu0 }
 0x138   :  { %v581_v48 = vpop.f32.mrf.mxu1  ;;  %v580_v49 = vadd.f32 %v579_v45, %v539_v46  ;;  %v541_v50 = vadd.f32 %v540_v47, %v181_v42 }
 0x139   :  { %v542_v51 = vpop.f32.mrf.mxu0 }
 0x13a   :  { %v583_v52 = vpop.f32.mrf.mxu1  ;;  %v582_v53 = vadd.f32 %v581_v48, %v541_v50  ;;  %v586_v54 = vmax.f32 %v580_v49, 0.0 }
 0x13b   :  { %v543_v55 = vpop.f32.mrf.mxu0 }
 0x13c   :  { %v584_v56 = vpop.f32.mrf.mxu1  ;;  %v587_v57 = vmax.f32 %v582_v53, 0.0  ;;  %v588_v59 = vpack.c.bf16 %v586_v54, %v586_v54 }
 0x13e   :  { %v589_v58 = vpack.c.bf16 %v587_v57, %v587_v57 }
 0x140   :  { %757 = vmatprep.mubr.bf16.mxu0 %v589_v58 }
 0x141   :  { %758 = vmatmul.mubr.bf16.vlgmr.msra.gmra.mxu0 %v588_v59 }
 0x201   :  { %v1002_v62 = vpop.f32.mrf.mxu0 }
 0x203   :  { %v1003_v0 = vpop.f32.mrf.mxu0 }
 0x204   :  { %v1004_v1 = vadd.f32 %v1003_v0, %v1002_v62 }
 0x205   :  { %v1005_v2 = vpop.f32.mrf.mxu0 }
 0x206   :  { %v760_v3 = vadd.f32 %v1004_v1, %v960_v63 }
 0x207   :  { %v1006_v4 = vpop.f32.mrf.mxu0 }
 0x208   :  { %v765_v5 = vmax.f32 %v760_v3, 0.0 }
 0x20a   :  { %v766_v6 = vpack.c.bf16 %v765_v5, %v765_v5 }
 0x20c   :  { %1034 = vmatmul.mubr.bf16.vlgmr.msra.gmra.mxu1 %v766_v6 }
 0x2cc   :  { %v872_v8 = vpop.f32.mrf.mxu1 }
 0x2cd   :  { %v873_v9 = vadd.f32 %v977_v7, %v872_v8 }
 0x2ce   :  { %v1035_v10 = vpop.f32.mrf.mxu1 }
 0x2cf   :  { %878 = vst [vmem:[#allocation10] sm:$0x3] %v873_v9 }
 0x2d0   :  { %v875_v11 = vpop.f32.mrf.mxu1 }
 0x2d1   :  { %1261 = shalt.err (!%p1258_p10)
}
 0x2d2   :  { %888 = dma.vmem_to_hbm [thread:$0]  %s886_s27, 32, %s1366_s7, [#allocation4]   ;;  %v1036_v12 = vpop.f32.mrf.mxu1 }
 0x2d3   :  { %1276 = dma.done.wait [#allocation4], 32  }
 0x2d4   :  { %1277 = vsyncadd [#allocation4], 4294967264 }
 0x2d5   :  { %892 = vsyncpa [#allocation3], 1 }
 0x2d6   :  { %893 = vsyncpa [#allocation6], 1 }
 0x2d7   :  { %894 = vsyncpa [#allocation9], 1 }
 0x2d8   :  { %895 = vsyncpa [#allocation4], 1 }

</bundles_post_ra>
